<compile_context>
chip_gen: v6e
topology: v6e:2x2x1
jax: 0.10.0
libtpu: 0.0.40
codegen_flags: <defaults>
</compile_context>

<pallas_src>
import functools

import jax
import jax.numpy as jnp
from jax.experimental import pallas as pl
from jax.experimental.pallas import tpu as pltpu

LN_EPS = 1e-5  # PyTorch nn.LayerNorm default


def _round_up(x, m):
    return ((x + m - 1) // m) * m


def mlp_encoder_kernel(x_ref, w1_ref, b1_ref, w2_ref, b2_ref, o_ref):
    """LayerNorm(normalize only) -> Linear+ReLU -> Linear+ReLU for one batch tile.

    x_ref:  (TILE_B, D)   f32
    w1_ref: (D, Hp)       bf16   (gamma already folded in)
    b1_ref: (1, Hp)       f32    (beta already folded in)
    w2_ref: (Hp, Hp)      bf16
    b2_ref: (1, Hp)       f32
    o_ref:  (TILE_B, Hp)  f32
    """
    x = x_ref[...]                                            # f32 (TILE_B, D)

    # --- LayerNorm statistics over the feature (lane) axis, f32 ---
    mean = jnp.mean(x, axis=-1, keepdims=True)                # (TILE_B, 1)
    centered = x - mean
    var = jnp.mean(centered * centered, axis=-1, keepdims=True)
    xn = centered * jax.lax.rsqrt(var + LN_EPS)               # affine folded into W1/b1

    # --- Linear(D, Hp) + ReLU : bf16 operands, f32 accumulate on the MXU ---
    h1 = jnp.dot(xn.astype(jnp.bfloat16), w1_ref[...],
                 preferred_element_type=jnp.float32) + b1_ref[...]
    h1 = jnp.maximum(h1, 0.0)

    # --- Linear(Hp, Hp) + ReLU ---
    h2 = jnp.dot(h1.astype(jnp.bfloat16), w2_ref[...],
                 preferred_element_type=jnp.float32) + b2_ref[...]
    h2 = jnp.maximum(h2, 0.0)

    o_ref[...] = h2.astype(o_ref.dtype)                       # lane-dense unmasked store


@jax.jit
def mlp_encoder(obs, gamma, beta, w1, b1, w2, b2):
    """obs: (B, C, H, W) float32. Returns (B, hidden) float32."""
    B = obs.shape[0]
    D = 1
    for s in obs.shape[1:]:
        D *= s
    H = w1.shape[1]

    # ---- parameter prep (one-time transforms, traced but trivially cheap) ----
    # Fold the LayerNorm affine into the first linear.
    w1f = gamma[:, None].astype(jnp.float32) * w1.astype(jnp.float32)   # (D, H)
    b1f = beta.astype(jnp.float32) @ w1.astype(jnp.float32) + b1        # (H,)

    # Pad the hidden dim to a lane-dense multiple of 128 (zero pad -> padded
    # columns stay exactly zero through bias-add and ReLU).
    Hp = _round_up(H, 128)
    ph = Hp - H
    w1p = jnp.pad(w1f, ((0, 0), (0, ph))).astype(jnp.bfloat16)          # (D, Hp)
    b1p = jnp.pad(b1f, ((0, ph),)).reshape(1, Hp).astype(jnp.float32)   # (1, Hp)
    w2p = jnp.pad(w2.astype(jnp.float32), ((0, ph), (0, ph))).astype(jnp.bfloat16)  # (Hp, Hp)
    b2p = jnp.pad(b2.astype(jnp.float32), ((0, ph),)).reshape(1, Hp)    # (1, Hp)

    # ---- batch tiling: pad B up to a multiple of an 8-aligned tile ----
    if B >= 256:
        TILE_B = 256           # matches v6e/v7x 2x256 MXU; also 128-aligned for v5e
    elif B >= 128:
        TILE_B = 128
    else:
        TILE_B = _round_up(B, 8)
    B_pad = _round_up(B, TILE_B)
    x = obs.reshape(B, D).astype(jnp.float32)      # nn.Flatten (row-major)
    x = jnp.pad(x, ((0, B_pad - B), (0, 0)))       # zero rows are LN-safe (var+eps > 0)

    grid = (B_pad // TILE_B,)

    # Advisory cost hint for XLA scheduling around the custom call.
    cost = pl.CostEstimate(
        flops=2 * B_pad * D * Hp + 2 * B_pad * Hp * Hp + 7 * B_pad * D,
        transcendentals=B_pad,  # one rsqrt per row
        bytes_accessed=B_pad * D * 4 + D * Hp * 2 + Hp * Hp * 2 + 2 * Hp * 4 + B_pad * Hp * 4,
    )

    # TODO(synk): if D grows large (real image inputs), add an "arbitrary" K-tiling
    # grid axis with a VMEM accumulator instead of loading W1 whole.
    out = pl.pallas_call(
        mlp_encoder_kernel,
        out_shape=jax.ShapeDtypeStruct((B_pad, Hp), jnp.float32),
        grid=grid,
        in_specs=[
            pl.BlockSpec((TILE_B, D), lambda i: (i, 0)),   # x: streamed per batch tile
            pl.BlockSpec((D, Hp), lambda i: (0, 0)),       # W1 (resident across tiles)
            pl.BlockSpec((1, Hp), lambda i: (0, 0)),       # b1
            pl.BlockSpec((Hp, Hp), lambda i: (0, 0)),      # W2
            pl.BlockSpec((1, Hp), lambda i: (0, 0)),       # b2
        ],
        out_specs=pl.BlockSpec((TILE_B, Hp), lambda i: (i, 0)),
        compiler_params=pltpu.CompilerParams(
            dimension_semantics=("parallel",),             # shard batch tiles across TCs (v7x)
            vmem_limit_bytes=48 * 1024 * 1024,             # fits v7x's 64 MiB VMEM
        ),
        cost_estimate=cost,
    )(x, w1p, b1p, w2p, b2p)

    return out[:B, :H]


def make_params(key, obs_dim, hidden_dim):
    """Deterministic synthetic parameters (shapes match the PyTorch module)."""
    D = 1
    for s in obs_dim:
        D *= s
    k1, k2, k3, k4, k5, k6 = jax.random.split(key, 6)
    # Non-default gamma/beta so the folded LayerNorm affine is actually exercised.
    gamma = 1.0 + 0.1 * jax.random.normal(k5, (D,), jnp.float32)
    beta = 0.1 * jax.random.normal(k6, (D,), jnp.float32)
    # Linear weights stored as (in, out); Kaiming-uniform-ish scale.
    w1 = jax.random.uniform(k1, (D, hidden_dim), jnp.float32, -1.0, 1.0) / jnp.sqrt(D)
    b1 = jax.random.uniform(k2, (hidden_dim,), jnp.float32, -1.0, 1.0) / jnp.sqrt(D)
    w2 = jax.random.uniform(k3, (hidden_dim, hidden_dim), jnp.float32, -1.0, 1.0) / jnp.sqrt(hidden_dim)
    b2 = jax.random.uniform(k4, (hidden_dim,), jnp.float32, -1.0, 1.0) / jnp.sqrt(hidden_dim)
    return gamma, beta, w1, b1, w2, b2


def reference(obs, gamma, beta, w1, b1, w2, b2):
    """Pure-JAX f32 reference mirroring the PyTorch forward."""
    B = obs.shape[0]
    x = obs.reshape(B, -1).astype(jnp.float32)
    mean = jnp.mean(x, axis=-1, keepdims=True)
    var = jnp.mean((x - mean) ** 2, axis=-1, keepdims=True)
    xn = (x - mean) / jnp.sqrt(var + LN_EPS) * gamma + beta
    h1 = jnp.maximum(xn @ w1 + b1, 0.0)
    h2 = jnp.maximum(h1 @ w2 + b2, 0.0)
    return h2


if __name__ == "__main__":
    # Small shapes consistent with the module: obs is image-like (NCHW),
    # obs_dim = (4, 16, 16) -> D = 1024, hidden_dim = 32, batch = 2.
    obs_dim = (4, 16, 16)
    hidden_dim = 32
    batch = 2

    key = jax.random.PRNGKey(0)
    k_obs, k_par = jax.random.split(key)
    obs = jax.random.normal(k_obs, (batch,) + obs_dim, jnp.float32)
    gamma, beta, w1, b1, w2, b2 = make_params(k_par, obs_dim, hidden_dim)

    out = mlp_encoder(obs, gamma, beta, w1, b1, w2, b2)
    out = jax.block_until_ready(out)

    ref = reference(obs, gamma, beta, w1, b1, w2, b2)
    assert out.shape == (batch, hidden_dim)
    # bf16 MXU operands with f32 accumulation -> loosen tolerance vs f32 reference.
    assert jnp.allclose(out, ref, atol=2e-2, rtol=2e-2), "mismatch vs reference"

    print("KERNEL_OK")
</pallas_src>

<mosaic_0001>
module attributes {stable_mosaic.version = 11 : i64} {
  func.func @mlp_encoder_kernel(%arg0: i32, %arg1: memref<8x1024xf32, #tpu.memory_space<vmem>>, %arg2: memref<1024x128xbf16, #tpu.memory_space<vmem>>, %arg3: memref<1x128xf32, #tpu.memory_space<vmem>>, %arg4: memref<128x128xbf16, #tpu.memory_space<vmem>>, %arg5: memref<1x128xf32, #tpu.memory_space<vmem>>, %arg6: memref<8x128xf32, #tpu.memory_space<vmem>>) attributes {dimension_semantics = [#tpu.dimension_semantics<parallel>], iteration_bounds = array<i64: 1>, scalar_prefetch = 0 : i64, scratch_operands = 0 : i64, tpu.core_type = #tpu.core_type<tc>, window_params = [{transform_indices = @transform_0, window_bounds = array<i64: 8, 1024>}, {pipeline_mode = #tpu.pipeline_mode<synchronous>, transform_indices = @transform_1, window_bounds = array<i64: 1024, 128>}, {pipeline_mode = #tpu.pipeline_mode<synchronous>, transform_indices = @transform_2, window_bounds = array<i64: 1, 128>}, {pipeline_mode = #tpu.pipeline_mode<synchronous>, transform_indices = @transform_3, window_bounds = array<i64: 128, 128>}, {pipeline_mode = #tpu.pipeline_mode<synchronous>, transform_indices = @transform_4, window_bounds = array<i64: 1, 128>}, {transform_indices = @transform_5, window_bounds = array<i64: 8, 128>}]} {
    %c0 = arith.constant 0 : index
    %c0_0 = arith.constant 0 : index
    %0 = vector.load %arg1[%c0, %c0_0] : memref<8x1024xf32, #tpu.memory_space<vmem>>, vector<8x1024xf32>
    %cst = arith.constant dense<0.000000e+00> : vector<8xf32>
    %1 = vector.multi_reduction <add>, %0, %cst [1] : vector<8x1024xf32> to vector<8xf32>
    %2 = vector.shape_cast %1 : vector<8xf32> to vector<8x1xf32>
    %cst_1 = arith.constant 1.024000e+03 : f32
    %3 = vector.broadcast %cst_1 : f32 to vector<8x1xf32>
    %4 = arith.divf %2, %3 : vector<8x1xf32>
    %5 = vector.broadcast %4 : vector<8x1xf32> to vector<8x1024xf32>
    %6 = arith.subf %0, %5 : vector<8x1024xf32>
    %7 = arith.mulf %6, %6 : vector<8x1024xf32>
    %cst_2 = arith.constant dense<0.000000e+00> : vector<8xf32>
    %8 = vector.multi_reduction <add>, %7, %cst_2 [1] : vector<8x1024xf32> to vector<8xf32>
    %9 = vector.shape_cast %8 : vector<8xf32> to vector<8x1xf32>
    %cst_3 = arith.constant 1.024000e+03 : f32
    %10 = vector.broadcast %cst_3 : f32 to vector<8x1xf32>
    %11 = arith.divf %9, %10 : vector<8x1xf32>
    %cst_4 = arith.constant 9.99999974E-6 : f32
    %12 = vector.broadcast %cst_4 : f32 to vector<8x1xf32>
    %13 = arith.addf %11, %12 : vector<8x1xf32>
    %14 = math.rsqrt %13 : vector<8x1xf32>
    %15 = vector.broadcast %14 : vector<8x1xf32> to vector<8x1024xf32>
    %16 = arith.mulf %6, %15 : vector<8x1024xf32>
    %17 = arith.truncf %16 : vector<8x1024xf32> to vector<8x1024xbf16>
    %c0_5 = arith.constant 0 : index
    %c0_6 = arith.constant 0 : index
    %18 = vector.load %arg2[%c0_5, %c0_6] : memref<1024x128xbf16, #tpu.memory_space<vmem>>, vector<1024x128xbf16>
    %cst_7 = arith.constant dense<0.000000e+00> : vector<8x128xf32>
    %19 = tpu.matmul %17, %18, %cst_7 {dimension_numbers = #tpu.dot_dimension_numbers<[1], [0], [0], [1], [0, 0, 1, 1], [], []>} : vector<8x1024xbf16>, vector<1024x128xbf16>, vector<8x128xf32> -> vector<8x128xf32>
    %c0_8 = arith.constant 0 : index
    %c0_9 = arith.constant 0 : index
    %20 = vector.load %arg3[%c0_8, %c0_9] : memref<1x128xf32, #tpu.memory_space<vmem>>, vector<1x128xf32>
    %21 = vector.broadcast %20 : vector<1x128xf32> to vector<8x128xf32>
    %22 = arith.addf %19, %21 : vector<8x128xf32>
    %cst_10 = arith.constant 0.000000e+00 : f32
    %23 = vector.broadcast %cst_10 : f32 to vector<8x128xf32>
    %24 = arith.maximumf %22, %23 : vector<8x128xf32>
    %25 = arith.truncf %24 : vector<8x128xf32> to vector<8x128xbf16>
    %c0_11 = arith.constant 0 : index
    %c0_12 = arith.constant 0 : index
    %26 = vector.load %arg4[%c0_11, %c0_12] : memref<128x128xbf16, #tpu.memory_space<vmem>>, vector<128x128xbf16>
    %cst_13 = arith.constant dense<0.000000e+00> : vector<8x128xf32>
    %27 = tpu.matmul %25, %26, %cst_13 {dimension_numbers = #tpu.dot_dimension_numbers<[1], [0], [0], [1], [0, 0, 1, 1], [], []>} : vector<8x128xbf16>, vector<128x128xbf16>, vector<8x128xf32> -> vector<8x128xf32>
    %c0_14 = arith.constant 0 : index
    %c0_15 = arith.constant 0 : index
    %28 = vector.load %arg5[%c0_14, %c0_15] : memref<1x128xf32, #tpu.memory_space<vmem>>, vector<1x128xf32>
    %29 = vector.broadcast %28 : vector<1x128xf32> to vector<8x128xf32>
    %30 = arith.addf %27, %29 : vector<8x128xf32>
    %cst_16 = arith.constant 0.000000e+00 : f32
    %31 = vector.broadcast %cst_16 : f32 to vector<8x128xf32>
    %32 = arith.maximumf %30, %31 : vector<8x128xf32>
    %c0_17 = arith.constant 0 : index
    %c0_18 = arith.constant 0 : index
    %33 = vector.load %arg6[%c0_17, %c0_18] : memref<8x128xf32, #tpu.memory_space<vmem>>, vector<8x128xf32>
    tpu.vector_store %arg6[%c0_17, %c0_18], %32 {strides = array<i32>} : memref<8x128xf32, #tpu.memory_space<vmem>>, vector<8x128xf32>,
    return
  }
  func.func @transform_0(%arg0: i32) -> (i32, i32) {
    %c0_i32 = arith.constant 0 : i32
    %c0_i32_0 = arith.constant 0 : i32
    return %arg0, %c0_i32 : i32, i32
  }
  func.func @transform_1(%arg0: i32) -> (i32, i32) {
    %c0_i32 = arith.constant 0 : i32
    %c0_i32_0 = arith.constant 0 : i32
    %c0_i32_1 = arith.constant 0 : i32
    return %c0_i32, %c0_i32_0 : i32, i32
  }
  func.func @transform_2(%arg0: i32) -> (i32, i32) {
    %c0_i32 = arith.constant 0 : i32
    %c0_i32_0 = arith.constant 0 : i32
    %c0_i32_1 = arith.constant 0 : i32
    return %c0_i32, %c0_i32_0 : i32, i32
  }
  func.func @transform_3(%arg0: i32) -> (i32, i32) {
    %c0_i32 = arith.constant 0 : i32
    %c0_i32_0 = arith.constant 0 : i32
    %c0_i32_1 = arith.constant 0 : i32
    return %c0_i32, %c0_i32_0 : i32, i32
  }
  func.func @transform_4(%arg0: i32) -> (i32, i32) {
    %c0_i32 = arith.constant 0 : i32
    %c0_i32_0 = arith.constant 0 : i32
    %c0_i32_1 = arith.constant 0 : i32
    return %c0_i32, %c0_i32_0 : i32, i32
  }
  func.func @transform_5(%arg0: i32) -> (i32, i32) {
    %c0_i32 = arith.constant 0 : i32
    %c0_i32_0 = arith.constant 0 : i32
    return %arg0, %c0_i32 : i32, i32
  }
}

</mosaic_0001>

<bundles_post_ra>
// kernel: mlp_encoder.1
= control target key start
LH: loop header
LB: loop body
LE: loop exit
PB: predicated region body
PF: predicated region fallthrough
CT: control target
= control target key end

     0   :  { %vm1150_vm0 = vmmov 0   ;;  %s1480_s0 = inlined_call_operand.vmem [shape: f32[8,1024], index: 0, kind: input, shape index: {}]   ;;  %s1481_s1 = inlined_call_operand.vmem [shape: bf16[1024,128], index: 1, kind: input, shape index: {}]   ;;  %s1482_s3 = inlined_call_operand.vmem [shape: bf16[128,128], index: 3, kind: input, shape index: {}]   ;;  %s1483_s2 = inlined_call_operand.vmem [shape: f32[1,128], index: 2, kind: input, shape index: {}]   ;;  %s1484_s4 = inlined_call_operand.vmem [shape: f32[1,128], index: 4, kind: input, shape index: {}]   ;;  %s1485_s5 = inlined_call_operand.vmem [shape: f32[8,128], index: 5, kind: output, shape index: {}]  }
   0x1   :  { %v21_v0 = vld [vmem:[%s1480_s0] sm:$0xff]  ;;  %v22_v1 = vld [vmem:[%s1480_s0 + $0x8] sm:$0xff]  ;;  %v23_v2 = vld [vmem:[%s1480_s0 + $0x10] sm:$0xff] }
   0x2   :  { %v29_v3 = vadd.f32 %v22_v1, %v21_v0  ;;  %v24_v4 = vld [vmem:[%s1480_s0 + $0x18] sm:$0xff]  ;;  %v25_v6 = vld [vmem:[%s1480_s0 + $0x20] sm:$0xff]  ;;  %v26_v8 = vld [vmem:[%s1480_s0 + $0x28] sm:$0xff] }
   0x3   :  { %v27_v10 = vld [vmem:[%s1480_s0 + $0x30] sm:$0xff]  ;;  %v28_v12 = vld [vmem:[%s1480_s0 + $0x38] sm:$0xff]  ;;  %v1083_v23 = vld [vmem:[%s1481_s1 + $0x68] sm:$0xff]  }
   0x4   :  { %v30_v5 = vadd.f32 %v29_v3, %v23_v2  ;;  %v1075_v15 = vld [vmem:[%s1481_s1 + $0x78] sm:$0xff]   ;;  %v1079_v19 = vld [vmem:[%s1481_s1 + $0x70] sm:$0xff]   ;;  %v1084_v24 = vld [vmem:[%s1481_s1 + $0xe8] sm:$0xff]  }
   0x5   :  { %v1076_v16 = vld [vmem:[%s1481_s1 + $0xf8] sm:$0xff]   ;;  %956 = vmatprep.subr.bf16.mxu0 %v1075_v15  ;;  %v1080_v20 = vld [vmem:[%s1481_s1 + $0xf0] sm:$0xff]   ;;  %v1085_v25 = vld [vmem:[%s1481_s1 + $0x28] sm:$0xff]  }
   0x6   :  { %v31_v7 = vadd.f32 %v30_v5, %v24_v4  ;;  %v1077_v17 = vld [vmem:[%s1481_s1 + $0x38] sm:$0xff]   ;;  %978 = vmatprep.subr.bf16.mxu1 %v1076_v16  ;;  %v1081_v21 = vld [vmem:[%s1481_s1 + $0x30] sm:$0xff]   ;;  %v1086_v26 = vld [vmem:[%s1481_s1 + $0xa8] sm:$0xff]  }
   0x7   :  { %v1078_v18 = vld [vmem:[%s1481_s1 + $0xb8] sm:$0xff]   ;;  %957 = vmatpush3.bf16.msra.mxu0 %v1077_v17  ;;  %v1082_v22 = vld [vmem:[%s1481_s1 + $0xb0] sm:$0xff]   ;;  %v1087_v52 = vld [vmem:[%s1481_s1 + $0x60] sm:$0xff]  }
   0x8   :  { %v32_v9 = vadd.f32 %v31_v7, %v25_v6  ;;  %979 = vmatpush3.bf16.msra.mxu1 %v1078_v18  ;;  %958 = vmatprep.subr.bf16.mxu0 %v1079_v19  ;;  %v1088_v53 = vld [vmem:[%s1481_s1 + $0xe0] sm:$0xff]   ;;  %v1091_v56 = vld [vmem:[%s1481_s1 + $0x58] sm:$0xff]   ;;  %v1095_v60 = vld [vmem:[%s1481_s1 + $0x50] sm:$0xff]  }
   0x9   :  { %980 = vmatprep.subr.bf16.mxu1 %v1080_v20  ;;  %v1089_v54 = vld [vmem:[%s1481_s1 + $0x20] sm:$0xff]   ;;  %v1092_v57 = vld [vmem:[%s1481_s1 + $0xd8] sm:$0xff]   ;;  %v1096_v61 = vld [vmem:[%s1481_s1 + $0xd0] sm:$0xff]  }
   0xa   :  { %v33_v11 = vadd.f32 %v32_v9, %v26_v8  ;;  %v1090_v55 = vld [vmem:[%s1481_s1 + $0xa0] sm:$0xff]   ;;  %v1093_v58 = vld [vmem:[%s1481_s1 + $0x18] sm:$0xff]   ;;  %v1097_v62 = vld [vmem:[%s1481_s1 + $0x10] sm:$0xff]  }
   0xb   :  { %959 = vmatpush3.bf16.msra.mxu0 %v1081_v21  ;;  %v1094_v59 = vld [vmem:[%s1481_s1 + $0x98] sm:$0xff]   ;;  %v1098_v63 = vld [vmem:[%s1481_s1 + $0x90] sm:$0xff]   ;;  %v1102_v3 = vld [vmem:[%s1481_s1 + $0x88] sm:$0xff]  }
   0xc   :  { %v34_v13 = vadd.f32 %v33_v11, %v27_v10  ;;  %981 = vmatpush3.bf16.msra.mxu1 %v1082_v22  ;;  %960 = vmatprep.subr.bf16.mxu0 %v1083_v23  ;;  %v1104_v5 = vld [vmem:[%s1481_s1 + $0xc0] sm:$0xff]   ;;  %v1108_v9 = vld [vmem:[%s1481_s1 + $0x1f8] sm:$0xff]  }
   0xd   :  { %982 = vmatprep.subr.bf16.mxu1 %v1084_v24  ;;  %v1106_v7 = vld [vmem:[%s1481_s1 + $0x80] sm:$0xff]   ;;  %v1109_v24 = vld [vmem:[%s1481_s1 + $0x138] sm:$0xff]  }
   0xe   :  { %v35_v14 = vadd.f32 %v34_v13, %v28_v12 }
   0xf   :  { %961 = vmatpush3.bf16.msra.mxu0 %v1085_v25  ;;  %v1110_v25 = vld [vmem:[%s1481_s1 + $0x1b8] sm:$0xff]  }
  0x10   :  { %36 = vadd.xlane.f32.xlu0 %v35_v14  ;;  %983 = vmatpush3.bf16.msra.mxu1 %v1086_v26  ;;  %v1111_v26 = vld [vmem:[%s1481_s1 + $0x170] sm:$0xff]  }
  0x11   :  { %962 = vmatprep.subr.bf16.mxu0 %v1087_v52  ;;  %984 = vmatprep.subr.bf16.mxu1 %v1088_v53  ;;  %v1133_v52 = vld [vmem:[%s1481_s1 + $0x108] sm:$0xff]  }
  0x12   :  { %v1134_v53 = vld [vmem:[%s1481_s1 + $0x188] sm:$0xff]  }
  0x13   :  { %963 = vmatpush3.bf16.msra.mxu0 %v1089_v54  ;;  %v1135_v54 = vld [vmem:[%s1481_s1 + $0x140] sm:$0xff]  }
  0x14   :  { %985 = vmatpush3.bf16.msra.mxu1 %v1090_v55  ;;  %964 = vmatprep.subr.bf16.mxu0 %v1091_v56  ;;  %v1136_v55 = vld [vmem:[%s1481_s1 + $0x1c0] sm:$0xff]  }
  0x15   :  { %986 = vmatprep.subr.bf16.mxu1 %v1092_v57  ;;  %v1137_v56 = vld [vmem:[%s1481_s1 + $0x100] sm:$0xff]  }
  0x16   :  { %v1138_v57 = vld [vmem:[%s1481_s1 + $0x180] sm:$0xff]  }
  0x17   :  { %965 = vmatpush3.bf16.msra.mxu0 %v1093_v58 }
  0x18   :  { %987 = vmatpush3.bf16.msra.mxu1 %v1094_v59  ;;  %966 = vmatprep.subr.bf16.mxu0 %v1095_v60 }
  0x19   :  { %988 = vmatprep.subr.bf16.mxu1 %v1096_v61 }
  0x1b   :  { %967 = vmatpush3.bf16.msra.mxu0 %v1097_v62  ;;  %v1149_v62 = vmov 0.0  }
  0x1c   :  { %989 = vmatpush3.bf16.msra.mxu1 %v1098_v63  ;;  %v1139_v63 = vld [vmem:[%s1482_s3 + $0x38] sm:$0xff]  }
  0x99   :  { %v37_v27 = vpop.xlane.xlu0 %36 }
  0x9a   :  { %v39_v28 = vmul.f32 0.0009765625, %v37_v27  ;;  %v1112_v27 = vld [vmem:[%s1481_s1 + $0x1f0] sm:$0xff]  }
  0x9c   :  { %v1241_v29 = vsub.f32 %v21_v0, %v39_v28  ;;  %v1243_v30 = vsub.f32 %v22_v1, %v39_v28  ;;  %v1245_v31 = vsub.f32 %v23_v2, %v39_v28  ;;  %v1247_v32 = vsub.f32 %v24_v4, %v39_v28  ;;  %v1099_v0 = vld [vmem:[%s1481_s1 + $0x48] sm:$0xff]   ;;  %v1103_v4 = vld [vmem:[%s1481_s1 + $0x40] sm:$0xff]  }
  0x9d   :  { %v1253_v35 = vsub.f32 %v25_v6, %v39_v28  ;;  %v1257_v38 = vsub.f32 %v26_v8, %v39_v28  ;;  %v1261_v41 = vsub.f32 %v27_v10, %v39_v28  ;;  %v1265_v44 = vsub.f32 %v28_v12, %v39_v28  ;;  %v1100_v1 = vld [vmem:[%s1481_s1 + $0xc8] sm:$0xff]   ;;  %968 = vmatprep.subr.bf16.mxu0 %v1099_v0  ;;  %v1105_v6 = vld [vmem:[%s1481_s1] sm:$0xff]   ;;  %v1107_v8 = vld [vmem:[%s1481_s1 + $0x178] sm:$0xff]  }
  0x9e   :  { %v48_v33 = vmul.f32 %v1241_v29, %v1241_v29  ;;  %v49_v34 = vmul.f32 %v1243_v30, %v1243_v30  ;;  %v50_v36 = vmul.f32 %v1245_v31, %v1245_v31  ;;  %v51_v39 = vmul.f32 %v1247_v32, %v1247_v32  ;;  %v1101_v2 = vld [vmem:[%s1481_s1 + $0x8] sm:$0xff]   ;;  %990 = vmatprep.subr.bf16.mxu1 %v1100_v1  ;;  %v1142_v0 = vld [vmem:[%s1482_s3 + $0x20] sm:$0xff]   ;;  %v1143_v1 = vld [vmem:[%s1482_s3 + $0x18] sm:$0xff]  }
  0x9f   :  { %v52_v42 = vmul.f32 %v1253_v35, %v1253_v35  ;;  %v53_v45 = vmul.f32 %v1257_v38, %v1257_v38  ;;  %v54_v47 = vmul.f32 %v1261_v41, %v1261_v41  ;;  %v55_v49 = vmul.f32 %v1265_v44, %v1265_v44  ;;  %969 = vmatpush3.bf16.msra.mxu0 %v1101_v2  ;;  %v1144_v2 = vld [vmem:[%s1482_s3 + $0x10] sm:$0xff]  }
  0xa0   :  { %v56_v37 = vadd.f32 %v49_v34, %v48_v33  ;;  %991 = vmatpush3.bf16.msra.mxu1 %v1102_v3  ;;  %970 = vmatprep.subr.bf16.mxu0 %v1103_v4  ;;  %v1116_v33 = vld [vmem:[%s1481_s1 + $0x1e8] sm:$0xff]   ;;  %v1146_v4 = vld [vmem:[%s1482_s3] sm:$0xff]  }
  0xa1   :  { %992 = vmatprep.subr.bf16.mxu1 %v1104_v5  ;;  %v1117_v34 = vld [vmem:[%s1481_s1 + $0x128] sm:$0xff]  }
  0xa2   :  { %v57_v40 = vadd.f32 %v56_v37, %v50_v36  ;;  %v1118_v36 = vld [vmem:[%s1481_s1 + $0x1a8] sm:$0xff]   ;;  %v1119_v37 = vld [vmem:[%s1481_s1 + $0x160] sm:$0xff]  }
  0xa3   :  { %971 = vmatpush3.bf16.msra.mxu0 %v1105_v6  ;;  %v1145_v3 = vld [vmem:[%s1482_s3 + $0x8] sm:$0xff]  }
  0xa4   :  { %v58_v43 = vadd.f32 %v57_v40, %v51_v39  ;;  %993 = vmatpush3.bf16.msra.mxu1 %v1106_v7  ;;  %1000 = vmatprep.subr.bf16.mxu0 %v1107_v8  ;;  %v1121_v39 = vld [vmem:[%s1481_s1 + $0x120] sm:$0xff]  }
  0xa5   :  { %1022 = vmatprep.subr.bf16.mxu1 %v1108_v9  ;;  %v1122_v40 = vld [vmem:[%s1481_s1 + $0x1a0] sm:$0xff]  }
  0xa6   :  { %v59_v46 = vadd.f32 %v58_v43, %v52_v42  ;;  %v1123_v42 = vld [vmem:[%s1481_s1 + $0x158] sm:$0xff]  }
  0xa7   :  { %v1124_v43 = vld [vmem:[%s1481_s1 + $0x1d8] sm:$0xff]  }
  0xa8   :  { %v60_v48 = vadd.f32 %v59_v46, %v53_v45  ;;  %v1126_v45 = vld [vmem:[%s1481_s1 + $0x198] sm:$0xff]   ;;  %v1127_v46 = vld [vmem:[%s1481_s1 + $0x150] sm:$0xff]  }
  0xaa   :  { %v61_v50 = vadd.f32 %v60_v48, %v54_v47  ;;  %v1128_v47 = vld [vmem:[%s1481_s1 + $0x1d0] sm:$0xff]  }
  0xab   :  { %v1129_v48 = vld [vmem:[%s1481_s1 + $0x110] sm:$0xff]  }
  0xac   :  { %v62_v51 = vadd.f32 %v61_v50, %v55_v49  ;;  %v1130_v49 = vld [vmem:[%s1481_s1 + $0x190] sm:$0xff]   ;;  %v1131_v50 = vld [vmem:[%s1481_s1 + $0x148] sm:$0xff]  }
  0xae   :  { %63 = vadd.xlane.f32.xlu0 %v62_v51  ;;  %v1132_v51 = vld [vmem:[%s1481_s1 + $0x1c8] sm:$0xff]  }
 0x137   :  { %v64_v10 = vpop.xlane.xlu0 %63 }
 0x138   :  { %v65_v11 = vmul.f32 0.0009765625, %v64_v10 }
 0x13a   :  { %v66_v12 = vadd.f32 1e-05, %v65_v11 }
 0x13c   :  { %1147 = vrsqrt.f32 %v66_v12 }
 0x149   :  { %v1339_v13 = vpop.eup %1147 }
 0x14a   :  { %v69_v14 = vmul.f32 %v1339_v13, %v1243_v30  ;;  %v71_v15 = vmul.f32 %v1339_v13, %v1247_v32  ;;  %v68_v16 = vmul.f32 %v1339_v13, %v1241_v29  ;;  %v70_v17 = vmul.f32 %v1339_v13, %v1245_v31  ;;  %v1113_v30 = vld [vmem:[%s1481_s1 + $0x130] sm:$0xff]   ;;  %v1115_v32 = vld [vmem:[%s1481_s1 + $0x168] sm:$0xff]  }
 0x14b   :  { %v73_v18 = vmul.f32 %v1339_v13, %v1257_v38  ;;  %v75_v19 = vmul.f32 %v1339_v13, %v1265_v44  ;;  %v1114_v31 = vld [vmem:[%s1481_s1 + $0x1b0] sm:$0xff]   ;;  %v1120_v38 = vld [vmem:[%s1481_s1 + $0x1e0] sm:$0xff]   ;;  %v1125_v44 = vld [vmem:[%s1481_s1 + $0x118] sm:$0xff]   ;;  %v72_v58 = vmul.f32 %v1339_v13, %v1253_v35  ;;  %v74_v59 = vmul.f32 %v1339_v13, %v1261_v41 }
 0x14c   :  { %v77_v20 = vpack.c.bf16 %v69_v14, %v69_v14  ;;  %v79_v21 = vpack.c.bf16 %v71_v15, %v71_v15  ;;  %v76_v22 = vpack.c.bf16 %v68_v16, %v68_v16  ;;  %v78_v23 = vpack.c.bf16 %v70_v17, %v70_v17  ;;  %v1140_v35 = vld [vmem:[%s1482_s3 + $0x30] sm:$0xff]   ;;  %v1141_v41 = vld [vmem:[%s1482_s3 + $0x28] sm:$0xff]   ;;  %v882_v14 = vld [vmem:[%s1483_s2] ss:$0 sm:$0xff] }
 0x14d   :  { %v81_v28 = vpack.c.bf16 %v73_v18, %v73_v18  ;;  %v83_v29 = vpack.c.bf16 %v75_v19, %v75_v19  ;;  %v80_v60 = vpack.c.bf16 %v72_v58, %v72_v58  ;;  %v82_v61 = vpack.c.bf16 %v74_v59, %v74_v59 }
 0x14e   :  { %635 = vmatprep.mubr.bf16.mxu0 %v77_v20  ;;  %675 = vmatprep.mubr.bf16.mxu1 %v79_v21 }
 0x14f   :  { %636 = vmatmul.mubr.bf16.vlgmr.msra.gmra.mxu0 %v76_v22  ;;  %676 = vmatmul.mubr.bf16.vlgmr.msra.gmra.mxu1 %v78_v23 }
 0x150   :  { %1001 = vmatpush3.bf16.msra.mxu0 %v1109_v24  ;;  %1023 = vmatpush3.bf16.msra.mxu1 %v1110_v25 }
 0x151   :  { %715 = vmatprep.mubr.bf16.mxu0 %v81_v28  ;;  %755 = vmatprep.mubr.bf16.mxu1 %v83_v29 }
 0x152   :  { %1002 = vmatprep.subr.bf16.mxu0 %v1111_v26  ;;  %1024 = vmatprep.subr.bf16.mxu1 %v1112_v27 }
 0x154   :  { %1003 = vmatpush3.bf16.msra.mxu0 %v1113_v30  ;;  %1025 = vmatpush3.bf16.msra.mxu1 %v1114_v31 }
 0x155   :  { %1004 = vmatprep.subr.bf16.mxu0 %v1115_v32  ;;  %1026 = vmatprep.subr.bf16.mxu1 %v1116_v33  ;;  %v947_v32 = vld [vmem:[%s1484_s4] ss:$0 sm:$0xff] }
 0x158   :  { %1005 = vmatpush3.bf16.msra.mxu0 %v1117_v34  ;;  %1027 = vmatpush3.bf16.msra.mxu1 %v1118_v36 }
 0x159   :  { %1006 = vmatprep.subr.bf16.mxu0 %v1119_v37  ;;  %1028 = vmatprep.subr.bf16.mxu1 %v1120_v38 }
 0x15c   :  { %1007 = vmatpush3.bf16.msra.mxu0 %v1121_v39  ;;  %1029 = vmatpush3.bf16.msra.mxu1 %v1122_v40 }
 0x15d   :  { %1008 = vmatprep.subr.bf16.mxu0 %v1123_v42  ;;  %1030 = vmatprep.subr.bf16.mxu1 %v1124_v43 }
 0x160   :  { %1009 = vmatpush3.bf16.msra.mxu0 %v1125_v44  ;;  %1031 = vmatpush3.bf16.msra.mxu1 %v1126_v45 }
 0x161   :  { %1010 = vmatprep.subr.bf16.mxu0 %v1127_v46  ;;  %1032 = vmatprep.subr.bf16.mxu1 %v1128_v47 }
 0x164   :  { %1011 = vmatpush3.bf16.msra.mxu0 %v1129_v48  ;;  %1033 = vmatpush3.bf16.msra.mxu1 %v1130_v49 }
 0x165   :  { %1012 = vmatprep.subr.bf16.mxu0 %v1131_v50  ;;  %1034 = vmatprep.subr.bf16.mxu1 %v1132_v51 }
 0x168   :  { %1013 = vmatpush3.bf16.msra.mxu0 %v1133_v52  ;;  %1035 = vmatpush3.bf16.msra.mxu1 %v1134_v53 }
 0x169   :  { %1014 = vmatprep.subr.bf16.mxu0 %v1135_v54  ;;  %1036 = vmatprep.subr.bf16.mxu1 %v1136_v55 }
 0x16c   :  { %1015 = vmatpush3.bf16.msra.mxu0 %v1137_v56  ;;  %1037 = vmatpush3.bf16.msra.mxu1 %v1138_v57 }
 0x16d   :  { %1053 = vmatprep.subr.bf16.mxu0 %v1149_v62 }
 0x16f   :  { %716 = vmatmul.mubr.bf16.vlgmr.msra.gmra.mxu0 %v80_v60  ;;  %756 = vmatmul.mubr.bf16.vlgmr.msra.gmra.mxu1 %v82_v61 }
 0x170   :  { %1054 = vmatpush3.bf16.msra.mxu0 %v1139_v63  ;;  %1069 = vmatprep.mubr.msk.bf16.mxu0 %vm1150_vm0, %v1149_v62 }
 0x171   :  { %1055 = vmatprep.subr.bf16.mxu0 %v1149_v62 }
 0x174   :  { %1056 = vmatpush3.bf16.msra.mxu0 %v1140_v35 }
 0x175   :  { %1057 = vmatprep.subr.bf16.mxu0 %v1149_v62 }
 0x178   :  { %1058 = vmatpush3.bf16.msra.mxu0 %v1141_v41 }
 0x179   :  { %1059 = vmatprep.subr.bf16.mxu0 %v1149_v62 }
 0x17c   :  { %1060 = vmatpush3.bf16.msra.mxu0 %v1142_v0 }
 0x17d   :  { %1061 = vmatprep.subr.bf16.mxu0 %v1149_v62 }
 0x180   :  { %1062 = vmatpush3.bf16.msra.mxu0 %v1143_v1 }
 0x181   :  { %1063 = vmatprep.subr.bf16.mxu0 %v1149_v62 }
 0x184   :  { %1064 = vmatpush3.bf16.msra.mxu0 %v1144_v2 }
 0x185   :  { %1065 = vmatprep.subr.bf16.mxu0 %v1149_v62 }
 0x188   :  { %1066 = vmatpush3.bf16.msra.mxu0 %v1145_v3 }
 0x189   :  { %1067 = vmatprep.subr.bf16.mxu0 %v1149_v62 }
 0x18c   :  { %1068 = vmatpush3.bf16.msra.mxu0 %v1146_v4 }
 0x20f   :  { %v972_v5 = vpop.f32.mrf.mxu0  ;;  %v994_v6 = vpop.f32.mrf.mxu1 }
 0x211   :  { %v973_v7 = vpop.f32.mrf.mxu0  ;;  %v995_v8 = vpop.f32.mrf.mxu1 }
 0x212   :  { %v974_v13 = vadd.f32 %v973_v7, %v972_v5  ;;  %v996_v18 = vadd.f32 %v995_v8, %v994_v6 }
 0x213   :  { %v975_v9 = vpop.f32.mrf.mxu0  ;;  %v997_v10 = vpop.f32.mrf.mxu1 }
 0x214   :  { %v638_v15 = vadd.f32 %v974_v13, %v882_v14 }
 0x215   :  { %v976_v11 = vpop.f32.mrf.mxu0  ;;  %v998_v12 = vpop.f32.mrf.mxu1 }
 0x216   :  { %v678_v21 = vadd.f32 %v996_v18, %v638_v15 }
 0x22f   :  { %v1016_v16 = vpop.f32.mrf.mxu0  ;;  %v1038_v17 = vpop.f32.mrf.mxu1 }
 0x231   :  { %v1017_v19 = vpop.f32.mrf.mxu0  ;;  %v1039_v20 = vpop.f32.mrf.mxu1 }
 0x232   :  { %v1018_v22 = vadd.f32 %v1017_v19, %v1016_v16  ;;  %v1040_v26 = vadd.f32 %v1039_v20, %v1038_v17 }
 0x233   :  { %v1019_v23 = vpop.f32.mrf.mxu0  ;;  %v1041_v24 = vpop.f32.mrf.mxu1 }
 0x234   :  { %v718_v25 = vadd.f32 %v1018_v22, %v678_v21 }
 0x235   :  { %v1020_v27 = vpop.f32.mrf.mxu0  ;;  %v1042_v28 = vpop.f32.mrf.mxu1 }
 0x236   :  { %v758_v29 = vadd.f32 %v1040_v26, %v718_v25 }
 0x238   :  { %v763_v30 = vmax.f32 %v758_v29, 0.0 }
 0x23a   :  { %v764_v31 = vpack.c.bf16 %v763_v30, %v763_v30 }
 0x23c   :  { %1070 = vmatmul.mubr.bf16.vlgmr.msra.gmra.mxu0 %v764_v31 }
 0x2fc   :  { %v870_v33 = vpop.f32.mrf.mxu0 }
 0x2fd   :  { %v871_v34 = vadd.f32 %v947_v32, %v870_v33 }
 0x2fe   :  { %v1071_v36 = vpop.f32.mrf.mxu0 }
 0x2ff   :  { %v876_v37 = vmax.f32 %v871_v34, 0.0 }
 0x300   :  { %v873_v38 = vpop.f32.mrf.mxu0 }
 0x301   :  { %877 = vst [vmem:[%s1485_s5] sm:$0xff] %v876_v37 }
 0x302   :  { %v1072_v39 = vpop.f32.mrf.mxu0 }

</bundles_post_ra>
